<compile_context>
chip_gen: v6e
topology: v6e:2x2x1
jax: 0.10.0
libtpu: 0.0.40
codegen_flags: <defaults>
</compile_context>

<pallas_src>
import math

import jax
import jax.numpy as jnp
from jax import lax
from jax.experimental import pallas as pl
from jax.experimental.pallas import tpu as pltpu

HIDDEN = 16  # fixed by the module: nn.Linear(embedding_dim, 16) -> nn.Linear(16, 1)


# ---------------------------------------------------------------------------
# Hardware-aware sizing helpers
# ---------------------------------------------------------------------------
def _vmem_capacity_bytes():
    try:
        info = pltpu.get_tpu_info()
        cap = getattr(info, "vmem_capacity_bytes", None)
        if cap:
            return int(cap)
    except Exception:
        pass
    return 64 << 20  # conservative (v7x-sized) fallback


def _seq_tile(seq_len, emb_dim, itemsize):
    """Sequence-tile length for streaming x.

    Targets ~1/10 of physical VMEM per x buffer (capped at 12 MiB): roughly
    8-12 MiB on v5e/v6e (128 MiB VMEM) and ~6 MiB on v7x (64 MiB VMEM), so the
    double-buffered tiles amortize the ~0.35us per-grid-step overhead with
    headroom.  Falls back to the full sequence (always a legal block shape).
    """
    target = min(_vmem_capacity_bytes() // 10, 12 << 20)
    if seq_len * emb_dim * itemsize <= target or seq_len % 8 != 0:
        return seq_len
    max_rows = max(8, target // max(1, emb_dim * itemsize))
    best = seq_len
    for cand in range(8, seq_len + 1, 8):
        if seq_len % cand == 0 and cand <= max_rows:
            best = cand
    return best


# ---------------------------------------------------------------------------
# Kernels (masked path only; the mask=None path never launches a kernel)
# ---------------------------------------------------------------------------
def _attention_kernel_single(x_ref, w1_ref, b1_ref, w2r_ref, mask_ref, o_ref):
    # One batch row per grid step; the whole sequence fits in the x tile.
    # x_ref:(1,S,E)  w1:(E,16)  b1:(1,16)  w2r:(1,16)  mask:(1,1,S) i32  o:(1,1,S)
    x = x_ref[0]                                                      # (S, E)
    h = jnp.dot(x, w1_ref[...], preferred_element_type=jnp.float32) + b1_ref[...]
    h = jnp.maximum(h, 0.0)                                           # ReLU
    # TODO(synk): nn.Dropout(drop_ratio) is identity here (drop_ratio=0 / eval);
    # training-mode dropout is not applied.
    # Lane-major logits straight off the MXU: (1,H) x (S,H)^T -> (1,S).
    # (b2 dropped: a constant shift of every logit is a softmax no-op.)
    logits = lax.dot_general(w2r_ref[...], h, (((1,), (1,)), ((), ())),
                             preferred_element_type=jnp.float32)      # (1, S)
    logits = jnp.where(mask_ref[0] != 0, jnp.float32(-100000.0), logits)
    m = jnp.max(logits, axis=1, keepdims=True)
    e = jnp.exp(logits - m)
    w = e / jnp.sum(e, axis=1, keepdims=True)
    o_ref[0] = w.astype(o_ref.dtype)                                  # (1, S) lane-dense


def _attention_kernel_tiled(x_ref, w1_ref, b1_ref, w2r_ref, mask_ref, o_ref, lscr):
    # Sequence streamed in (1,TS,E) tiles; logits stashed in VMEM, softmax at end.
    # lscr:(S,1) f32 scratch, o_ref:(1,1,S) resident across the seq axis.
    j = pl.program_id(1)
    nj = pl.num_programs(1)
    ts = x_ref.shape[1]

    x = x_ref[0]                                                      # (TS, E)
    h = jnp.dot(x, w1_ref[...], preferred_element_type=jnp.float32) + b1_ref[...]
    h = jnp.maximum(h, 0.0)
    # TODO(synk): dropout identity (drop_ratio=0 / eval mode).
    # Second "matmul" (N=1) as a VPU reduce instead of an MXU pass.
    col = jnp.sum(h * w2r_ref[...], axis=1, keepdims=True)            # (TS, 1)
    off = pl.multiple_of(j * ts, ts)
    lscr[pl.ds(off, ts), :] = col

    @pl.when(j == nj - 1)
    def _finalize():
        logits = jnp.transpose(lscr[...])                             # (1, S) lane-major
        logits = jnp.where(mask_ref[0] != 0, jnp.float32(-100000.0), logits)
        m = jnp.max(logits, axis=1, keepdims=True)
        e = jnp.exp(logits - m)
        w = e / jnp.sum(e, axis=1, keepdims=True)
        o_ref[0] = w.astype(o_ref.dtype)


# ---------------------------------------------------------------------------
# Wrapper
# ---------------------------------------------------------------------------
def attention_layer(x, w1, b1, w2, b2, mask=None):
    """weight = softmax(Linear2(ReLU(Linear1(x)))) with optional masked_fill."""
    B, S, E = x.shape
    H = w1.shape[1]
    assert w1.shape == (E, H) and w2.shape == (H, 1)

    if mask is None:
        # softmax over dim=2 of a (B, S, 1) tensor is identically 1.0: skip the
        # kernel (and the whole HBM read of x) entirely.
        return jnp.ones((B, S, 1), dtype=x.dtype)

    itemsize = jnp.dtype(x.dtype).itemsize
    ts = _seq_tile(S, E, itemsize)
    if S % ts != 0:
        ts = S
    nj = S // ts

    b1_2d = jnp.reshape(b1, (1, H)).astype(jnp.float32)
    w2_row = jnp.reshape(w2, (1, H)).astype(jnp.float32)     # transposed: lane-dense
    # b2 intentionally unused: constant logit shift does not change the softmax.
    mask_i = jnp.reshape(mask, (B, 1, S)).astype(jnp.int32)  # lane-dense mask

    out_shape = jax.ShapeDtypeStruct((B, 1, S), x.dtype)     # lane-dense output

    cost = pl.CostEstimate(
        flops=2 * B * S * E * H + 2 * B * S * H,
        transcendentals=B * S,
        bytes_accessed=B * S * E * itemsize                  # x
        + B * S * 4                                          # mask (int32)
        + B * S * itemsize                                   # output
        + (w1.size + b1.size + w2.size) * itemsize,
    )

    compiler_kwargs = {}
    est_vmem = 2 * ts * E * itemsize + 4 * S * itemsize + 8 * S + E * H * itemsize + (64 << 10)
    if est_vmem > (12 << 20):
        cap = _vmem_capacity_bytes()
        compiler_kwargs["vmem_limit_bytes"] = int(min(max(2 * est_vmem, 32 << 20), cap * 3 // 4))

    if nj == 1:
        out = pl.pallas_call(
            _attention_kernel_single,
            grid=(B,),
            in_specs=[
                pl.BlockSpec((1, S, E), lambda b: (b, 0, 0)),      # x: one batch row
                pl.BlockSpec((E, H), lambda b: (0, 0)),            # w1: resident
                pl.BlockSpec((1, H), lambda b: (0, 0)),            # b1: resident
                pl.BlockSpec((1, H), lambda b: (0, 0)),            # w2 row: resident
                pl.BlockSpec((1, 1, S), lambda b: (b, 0, 0)),      # mask: lane-dense
            ],
            out_specs=pl.BlockSpec((1, 1, S), lambda b: (b, 0, 0)),
            out_shape=out_shape,
            compiler_params=pltpu.CompilerParams(
                dimension_semantics=("parallel",), **compiler_kwargs),
            cost_estimate=cost,
        )(x, w1, b1_2d, w2_row, mask_i)
    else:
        out = pl.pallas_call(
            _attention_kernel_tiled,
            grid=(B, nj),
            in_specs=[
                pl.BlockSpec((1, ts, E), lambda b, j: (b, j, 0)),  # x: streamed tiles
                pl.BlockSpec((E, H), lambda b, j: (0, 0)),
                pl.BlockSpec((1, H), lambda b, j: (0, 0)),
                pl.BlockSpec((1, H), lambda b, j: (0, 0)),
                pl.BlockSpec((1, 1, S), lambda b, j: (b, 0, 0)),   # mask resident per row
            ],
            out_specs=pl.BlockSpec((1, 1, S), lambda b, j: (b, 0, 0)),
            out_shape=out_shape,
            scratch_shapes=[pltpu.VMEM((S, 1), jnp.float32)],
            compiler_params=pltpu.CompilerParams(
                dimension_semantics=("parallel", "arbitrary"), **compiler_kwargs),
            cost_estimate=cost,
        )(x, w1, b1_2d, w2_row, mask_i)

    # (B, 1, S) and (B, S, 1) are the same bytes row-major: free reshape.
    return jnp.reshape(out, (B, S, 1))


def make_attention_layer(embedding_dim, drop_ratio=0.0, dtype=jnp.float32, key=None):
    """Initialises parameters like the PyTorch module and returns (apply, params)."""
    if key is None:
        key = jax.random.PRNGKey(0)
    k1, k2, k3, k4 = jax.random.split(key, 4)
    bound1 = 1.0 / math.sqrt(embedding_dim)
    bound2 = 1.0 / math.sqrt(HIDDEN)
    params = dict(
        w1=jax.random.uniform(k1, (embedding_dim, HIDDEN), dtype, -bound1, bound1),
        b1=jax.random.uniform(k2, (HIDDEN,), dtype, -bound1, bound1),
        w2=jax.random.uniform(k3, (HIDDEN, 1), dtype, -bound2, bound2),
        b2=jax.random.uniform(k4, (1,), dtype, -bound2, bound2),
    )

    def apply(p, x, mask=None):
        return attention_layer(x, p["w1"], p["b1"], p["w2"], p["b2"], mask=mask)

    return apply, params


# ---------------------------------------------------------------------------
# Reference (pure JAX) for validation
# ---------------------------------------------------------------------------
def _reference(x, w1, b1, w2, b2, mask=None):
    out = jnp.maximum(jnp.einsum("bse,eh->bsh", x, w1) + b1, 0.0)
    out = jnp.einsum("bsh,ho->bso", out, w2) + b2
    if mask is not None:
        out = jnp.where(jnp.reshape(mask, out.shape), -100000.0, out)
        return jax.nn.softmax(out, axis=1)
    return jax.nn.softmax(out, axis=2)


# ---------------------------------------------------------------------------
# Main
# ---------------------------------------------------------------------------
if __name__ == "__main__":
    B, S, E = 2, 8, 32

    key = jax.random.PRNGKey(0)
    kx, kp, km = jax.random.split(key, 3)
    x = jax.random.normal(kx, (B, S, E), dtype=jnp.float32)

    apply_fn, params = make_attention_layer(E, drop_ratio=0.0, key=kp)

    # --- masked path: Pallas kernel (masked_fill(-100000) + softmax over dim=1)
    mask = jax.random.bernoulli(km, 0.3, (B, S, 1))
    out_mask = jax.block_until_ready(apply_fn(params, x, mask=mask))
    ref_mask = _reference(x, params["w1"], params["b1"], params["w2"], params["b2"], mask=mask)
    assert out_mask.shape == (B, S, 1)
    assert jnp.allclose(out_mask, ref_mask, atol=1e-5, rtol=1e-5), "masked path mismatch"
    assert jnp.allclose(jnp.sum(out_mask, axis=1), 1.0, atol=1e-5), "softmax not normalized"

    # --- mask=None path: softmax over a size-1 axis == 1.0 (wrapper short-circuit)
    out_nomask = jax.block_until_ready(apply_fn(params, x))
    ref_nomask = _reference(x, params["w1"], params["b1"], params["w2"], params["b2"])
    assert out_nomask.shape == (B, S, 1)
    assert jnp.allclose(out_nomask, ref_nomask, atol=1e-5, rtol=1e-5), "no-mask path mismatch"

    print("KERNEL_OK")
</pallas_src>

<mosaic_0001>
module attributes {stable_mosaic.version = 11 : i64} {
  func.func @_attention_kernel_single(%arg0: i32, %arg1: memref<1x8x32xf32, #tpu.memory_space<vmem>>, %arg2: memref<32x16xf32, #tpu.memory_space<vmem>>, %arg3: memref<1x16xf32, #tpu.memory_space<vmem>>, %arg4: memref<1x16xf32, #tpu.memory_space<vmem>>, %arg5: memref<1x1x8xi32, #tpu.memory_space<vmem>>, %arg6: memref<1x1x8xf32, #tpu.memory_space<vmem>>) attributes {dimension_semantics = [#tpu.dimension_semantics<parallel>], iteration_bounds = array<i64: 2>, scalar_prefetch = 0 : i64, scratch_operands = 0 : i64, tpu.core_type = #tpu.core_type<tc>, window_params = [{transform_indices = @transform_0, window_bounds = array<i64: 1, 8, 32>}, {pipeline_mode = #tpu.pipeline_mode<synchronous>, transform_indices = @transform_1, window_bounds = array<i64: 32, 16>}, {pipeline_mode = #tpu.pipeline_mode<synchronous>, transform_indices = @transform_2, window_bounds = array<i64: 1, 16>}, {pipeline_mode = #tpu.pipeline_mode<synchronous>, transform_indices = @transform_3, window_bounds = array<i64: 1, 16>}, {transform_indices = @transform_4, window_bounds = array<i64: 1, 1, 8>}, {transform_indices = @transform_5, window_bounds = array<i64: 1, 1, 8>}]} {
    %c0 = arith.constant 0 : index
    %c0_0 = arith.constant 0 : index
    %c0_1 = arith.constant 0 : index
    %0 = vector.load %arg1[%c0, %c0_0, %c0_1] : memref<1x8x32xf32, #tpu.memory_space<vmem>>, vector<1x8x32xf32>
    %1 = vector.shape_cast %0 : vector<1x8x32xf32> to vector<8x32xf32>
    %c0_2 = arith.constant 0 : index
    %c0_3 = arith.constant 0 : index
    %2 = vector.load %arg2[%c0_2, %c0_3] : memref<32x16xf32, #tpu.memory_space<vmem>>, vector<32x16xf32>
    %cst = arith.constant dense<0.000000e+00> : vector<8x16xf32>
    %3 = tpu.matmul %1, %2, %cst {dimension_numbers = #tpu.dot_dimension_numbers<[1], [0], [0], [1], [0, 0, 1, 1], [], []>} : vector<8x32xf32>, vector<32x16xf32>, vector<8x16xf32> -> vector<8x16xf32>
    %c0_4 = arith.constant 0 : index
    %c0_5 = arith.constant 0 : index
    %4 = vector.load %arg3[%c0_4, %c0_5] : memref<1x16xf32, #tpu.memory_space<vmem>>, vector<1x16xf32>
    %5 = vector.broadcast %4 : vector<1x16xf32> to vector<8x16xf32>
    %6 = arith.addf %3, %5 : vector<8x16xf32>
    %cst_6 = arith.constant 0.000000e+00 : f32
    %7 = vector.broadcast %cst_6 : f32 to vector<8x16xf32>
    %8 = arith.maximumf %6, %7 : vector<8x16xf32>
    %c0_7 = arith.constant 0 : index
    %c0_8 = arith.constant 0 : index
    %9 = vector.load %arg4[%c0_7, %c0_8] : memref<1x16xf32, #tpu.memory_space<vmem>>, vector<1x16xf32>
    %cst_9 = arith.constant dense<0.000000e+00> : vector<1x8xf32>
    %10 = tpu.matmul %9, %8, %cst_9 {dimension_numbers = #tpu.dot_dimension_numbers<[1], [1], [0], [0], [0, 0, 1, 0], [], []>} : vector<1x16xf32>, vector<8x16xf32>, vector<1x8xf32> -> vector<1x8xf32>
    %c0_10 = arith.constant 0 : index
    %c0_11 = arith.constant 0 : index
    %c0_12 = arith.constant 0 : index
    %11 = vector.load %arg5[%c0_10, %c0_11, %c0_12] : memref<1x1x8xi32, #tpu.memory_space<vmem>>, vector<1x1x8xi32>
    %12 = vector.shape_cast %11 : vector<1x1x8xi32> to vector<1x8xi32>
    %c0_i32 = arith.constant 0 : i32
    %13 = vector.broadcast %c0_i32 : i32 to vector<1x8xi32>
    %14 = arith.cmpi ne, %12, %13 : vector<1x8xi32>
    %cst_13 = arith.constant -1.000000e+05 : f32
    %15 = vector.broadcast %cst_13 : f32 to vector<1x8xf32>
    %16 = arith.select %14, %15, %10 : vector<1x8xi1>, vector<1x8xf32>
    %cst_14 = arith.constant dense<0xFF800000> : vector<1xf32>
    %17 = vector.multi_reduction <maximumf>, %16, %cst_14 [1] : vector<1x8xf32> to vector<1xf32>
    %18 = vector.shape_cast %17 : vector<1xf32> to vector<1x1xf32>
    %19 = vector.broadcast %18 : vector<1x1xf32> to vector<1x8xf32>
    %20 = arith.subf %16, %19 : vector<1x8xf32>
    %21 = math.exp %20 : vector<1x8xf32>
    %cst_15 = arith.constant dense<0.000000e+00> : vector<1xf32>
    %22 = vector.multi_reduction <add>, %21, %cst_15 [1] : vector<1x8xf32> to vector<1xf32>
    %23 = vector.shape_cast %22 : vector<1xf32> to vector<1x1xf32>
    %24 = vector.broadcast %23 : vector<1x1xf32> to vector<1x8xf32>
    %25 = arith.divf %21, %24 : vector<1x8xf32>
    %c0_16 = arith.constant 0 : index
    %c0_17 = arith.constant 0 : index
    %c0_18 = arith.constant 0 : index
    %26 = vector.load %arg6[%c0_16, %c0_17, %c0_18] : memref<1x1x8xf32, #tpu.memory_space<vmem>>, vector<1x1x8xf32>
    %27 = vector.shape_cast %26 : vector<1x1x8xf32> to vector<1x8xf32>
    %28 = vector.shape_cast %25 : vector<1x8xf32> to vector<1x1x8xf32>
    tpu.vector_store %arg6[%c0_16, %c0_17, %c0_18], %28 {strides = array<i32>} : memref<1x1x8xf32, #tpu.memory_space<vmem>>, vector<1x1x8xf32>,
    return
  }
  func.func @transform_0(%arg0: i32) -> (i32, i32, i32) {
    %c0_i32 = arith.constant 0 : i32
    %c0_i32_0 = arith.constant 0 : i32
    %c0_i32_1 = arith.constant 0 : i32
    return %arg0, %c0_i32, %c0_i32_0 : i32, i32, i32
  }
  func.func @transform_1(%arg0: i32) -> (i32, i32) {
    %c0_i32 = arith.constant 0 : i32
    %c0_i32_0 = arith.constant 0 : i32
    %c0_i32_1 = arith.constant 0 : i32
    return %c0_i32, %c0_i32_0 : i32, i32
  }
  func.func @transform_2(%arg0: i32) -> (i32, i32) {
    %c0_i32 = arith.constant 0 : i32
    %c0_i32_0 = arith.constant 0 : i32
    %c0_i32_1 = arith.constant 0 : i32
    return %c0_i32, %c0_i32_0 : i32, i32
  }
  func.func @transform_3(%arg0: i32) -> (i32, i32) {
    %c0_i32 = arith.constant 0 : i32
    %c0_i32_0 = arith.constant 0 : i32
    %c0_i32_1 = arith.constant 0 : i32
    return %c0_i32, %c0_i32_0 : i32, i32
  }
  func.func @transform_4(%arg0: i32) -> (i32, i32, i32) {
    %c0_i32 = arith.constant 0 : i32
    %c0_i32_0 = arith.constant 0 : i32
    %c0_i32_1 = arith.constant 0 : i32
    return %arg0, %c0_i32, %c0_i32_0 : i32, i32, i32
  }
  func.func @transform_5(%arg0: i32) -> (i32, i32, i32) {
    %c0_i32 = arith.constant 0 : i32
    %c0_i32_0 = arith.constant 0 : i32
    %c0_i32_1 = arith.constant 0 : i32
    return %arg0, %c0_i32, %c0_i32_0 : i32, i32, i32
  }
}

</mosaic_0001>

<bundles_post_ra>
// kernel: tpu_custom_call.1
= control target key start
LH: loop header
LB: loop body
LE: loop exit
PB: predicated region body
PF: predicated region fallthrough
CT: control target
= control target key end

     0   :  { %10 = vsyncpa [#allocation3], 0  ;;  %s777_s0 = inlined_call_operand.vmem [shape: f32[2,8,32], index: 0, kind: input, shape index: {}]   ;;  %s778_s1 = inlined_call_operand.vmem [shape: f32[32,16], index: 1, kind: input, shape index: {}]   ;;  %s779_s2 = inlined_call_operand.vmem [shape: f32[1,16], index: 2, kind: input, shape index: {}]   ;;  %s780_s3 = inlined_call_operand.vmem [shape: f32[1,16], index: 3, kind: input, shape index: {}]   ;;  %s781_s4 = inlined_call_operand.vmem [shape: s32[2,1,8], index: 4, kind: input, shape index: {}]   ;;  %s782_s5 = inlined_call_operand.hbm [shape: f32[2,1,8], index: 5, kind: output, shape index: {}]  }
   0x1   :  { %12 = vsyncpa [#allocation3 + $0x1], 0  ;;  %s666_s18 = smov 0   ;;  %s668_s19 = smov 0  }
   0x2   :  { %s670_s20 = smov 0   ;;  %s672_s21 = smov 0  }
   0x3 LB: > { %s687_s22 = sadd.s32 4294967295, %s631_s21   ;;  %s491_s23 = sadd.s32 4294967294, %s631_s21   ;;  %s631_s21 = sphi %s672_s21, %s788_s21   ;;  %s627_s20 = sphi %s670_s20, %s787_s20   ;;  %s623_s19 = sphi %s668_s19, %s786_s19   ;;  %s619_s18 = sphi %s666_s18, %s785_s18  }
   0x4   : > { %s691_s24 = sadd.s32 1, %s631_s21   ;;  %s140_s25 = sadd.s32 1, %s627_s20 }
   0x5   : > { %s137_s26 = ssub.s32 %s631_s21, %s691_s24  ;;  %p150_p0 = scmp.ne.s32.totalorder %s627_s20, %s623_s19 }
   0x6   : > { %p138_p1 = scmp.eq.s32.totalorder %s137_s26, 0  ;;  %p151_p2 = scmp.eq.s32.totalorder %s687_s22, 1 }
   0x7   : > { %p156_p3 = scmp.ne.s32.totalorder %s623_s19, %s619_s18  ;;  %p157_p4 = scmp.eq.s32.totalorder %s491_s23, 1 }
   0x8   : > { %s702_s27 = scalar_select %p138_p1, %s627_s20, %s140_s25  }
   0x9   : > { %p704_p5 = por %p151_p2, %p150_p0  ;;  %p708_p6 = por %p157_p4, %p156_p3 }
   0xa   : > { %p494_p7 = scmp.ge.s32.totalorder %s631_s21, 1  ;;  %p197_p8 = scmp.lt.s32.totalorder %s631_s21, 3 }
   0xc   : > { %p198_p9 = pnand %p494_p7, %p197_p8 }
   0xd   : > { %p226_p10 = scmp.lt.s32.totalorder (!%p198_p9), %s687_s22, 1  ;;  %s500_s10 = sshll.u32 (!%p198_p9), %s687_s22, 4 }
   0xe   : > { %201 = sbr.rel (%p198_p9) target bundleno = 747 (0x2eb), region = 40  ;;  %s425_s15 = scalar_lea.hbm (!%p198_p9), %s782_s5, %s500_s10 }
   0xf   : > { %s635_s23 = smov (!%p198_p9), [#allocation2]  }
  0x10   : > { %s575_s25 = sshll.u32 (!%p198_p9), %s635_s23, 4  ;;  %s576_s25 = int_to_ptr.vmem [resolvable:$false] %s575_s25 }
  0x13   : > { %v237_v0 = vld [vmem:[%s778_s1 + $0x18] sm:$0xff]  ;;  %v633_v1 = vmov 0.0   ;;  %v236_v2 = vld [vmem:[%s778_s1 + $0x10] sm:$0xff]  ;;  %vm634_vm0 = vmmov 0   ;;  %s227_s9 = scalar_select %p226_p10, %s687_s22, 1  ;;  %v235_v3 = vld [vmem:[%s778_s1 + $0x8] sm:$0xff] }
  0x14   : > { %510 = vmatprep.subr.mxu0 %v633_v1  ;;  %518 = vmatprep.mubr.msk.f32.mxu0 %vm634_vm0, %v633_v1  ;;  %v234_v4 = vld [vmem:[%s778_s1] sm:$0xff]  ;;  %vm245_vm1 = vcmask 261120   ;;  %vm321_vm2 = vcmask 130048   ;;  %vm401_vm4 = vcmask 57344   ;;  %s577_s22 = scalar_lea.vmem %s576_s25, 32 }
  0x15   : > { %511 = vmatpush3.msra.mxu0 %v237_v0  ;;  %521 = vmatprep.subr.mxu1 %v633_v1  ;;  %s495_s12 = sshll.u32 %s227_s9, 3  ;;  %v496_v6 = vld [vmem:[%s779_s2] ss:$0 sm:$0xff]  ;;  %s232_s8 = scalar_lea.vmem %s781_s4, %s227_s9 }
  0x16   : > { %512 = vmatprep.subr.mxu0 %v633_v1  ;;  %523 = vmatprep.mubr.msk.f32.mxu1 %vm634_vm0, %v633_v1  ;;  %s229_s17 = scalar_lea.vmem %s777_s0, %s495_s12  ;;  %v320_v11 = vld [vmem:[%s780_s3] sm:$0x1]  ;;  %s224_s9 = sand.u32 1, %s623_s19  }
  0x17   : > { %513 = vmatpush3.msra.mxu0 %v236_v2  ;;  %v233_v5 = vld [vmem:[%s229_s17] sm:$0xff]  ;;  %s225_s11 = scalar_lea.vmem [#allocation2], %s224_s9  ;;  %s415_s16 = scalar_lea.sflag [#allocation3], %s224_s9 }
  0x18   : > { %514 = vmatprep.subr.mxu0 %v633_v1  ;;  %v398_v12 = vld [vmem:[%s232_s8] sm:$0x1]  ;;  %s427_s12 = sshll.u32 %s225_s11, 4  ;;  %s428_s12 = int_to_ptr.vmem [resolvable:$true] %s427_s12 }
  0x19   : > { %515 = vmatpush3.msra.mxu0 %v235_v3  ;;  %vm399_vm3 = vcmp.ne.s32.totalorder %v398_v12, 0  ;;  %s571_s17 = scalar_lea.vmem %s428_s12, 16  ;;  %p578_p0 = scmp.lt.s32.totalorder %s428_s12, %s576_s25 }
  0x1a   : > { %516 = vmatprep.subr.mxu0 %v633_v1  ;;  %p572_p11 = scmp.ne.s32.totalorder %s428_s12, %s571_s17  ;;  %p579_p1 = scmp.lt.s32.totalorder %s577_s22, %s571_s17 }
  0x1b   : > { %517 = vmatpush3.msra.mxu0 %v234_v4 }
  0x1c   : > { %519 = vmatmul.mubr.msk.f32.vlgmr.msra.gmra.mxu0 %vm245_vm1, %v233_v5  ;;  %p573_p12 = pnand %p572_p11, %p704_p5  ;;  %p580_p2 = por %p579_p1, %p578_p0 }
  0x1e   : > { %p574_p13 = pneg %p573_p12 }
  0x20   : > { %p581_p3 = pnand %p580_p2, %p574_p13 }
  0xdc   : > { %v315_v7 = vpop.f32.mrf.mxu0 }
  0xdd   : > { %v316_v8 = vadd.f32 %v496_v6, %v315_v7 }
  0xde   : > { %v520_v9 = vpop.f32.mrf.mxu0 }
  0xdf   : > { %v319_v10 = vmax.f32 %v316_v8, 0.0 }
  0xe1   : > { %522 = vmatpush3.xpose.msk.msra.mxu1 %vm321_vm2, %v319_v10 }
  0xe4   : > { %524 = vmatmul.mubr.msk.f32.vlgmr.msra.gmra.mxu1 %vm321_vm2, %v320_v11 }
 0x1a4   : > { %v394_v13 = vpop.f32.mrf.mxu1 }
 0x1a5   : > { %v400_v14 = vsel %vm399_vm3, -100000.0, %v394_v13 }
 0x1a6   : > { %v525_v15 = vpop.f32.mrf.mxu1  ;;  %v402_v16 = vsel %vm401_vm4, %v400_v14, -inf }
 0x1a7   : > { %403 = vmax.xlane.f32.xlu0 %v402_v16 }
 0x230   : > { %v404_v17 = vpop.xlane.xlu0 %403 }
 0x231   : > { %v405_v18 = vsub.f32 %v400_v14, %v404_v17 }
 0x233   : > { %v406_v19 = vmul.f32 1.442695, %v405_v18 }
 0x235   : > { %567 = vpow2.f32 %v406_v19 }
 0x242   : > { %v568_v20 = vpop.eup %567 }
 0x243   : > { %v408_v21 = vsel %vm401_vm4, %v568_v20, 0.0 }
 0x244   : > { %409 = vadd.xlane.f32.xlu0 %v408_v21 }
 0x2cd   : > { %v410_v22 = vpop.xlane.xlu0 %409 }
 0x2ce   : > { %569 = vrcp.f32 %v410_v22 }
 0x2db   : > { %v570_v23 = vpop.eup %569 }
 0x2dc   : > { %v412_v24 = vmul.f32 %v570_v23, %v568_v20 }
 0x2de   : > { %413 = vst.msk [vmem:[%s225_s11] sm:$0x1] %vm401_vm4, %v412_v24 }
 0x2df   : > { %584 = shalt.err (!%p581_p3)
}
 0x2e0   : > { %s585_s26 = scalar_lea.hbm %s425_s15, 16  ;;  %s589_s7 = scalar_lea.hbm %s782_s5, 32 }
 0x2e1   : > { %p586_p4 = scmp.ne.s32.totalorder %s425_s15, %s585_s26  ;;  %p590_p9 = scmp.lt.s32.totalorder %s425_s15, %s782_s5 }
 0x2e2   : > { %p591_p10 = scmp.lt.s32.totalorder %s589_s7, %s585_s26 }
 0x2e3   : > { %p587_p7 = pnand %p586_p4, %p704_p5 }
 0x2e4   : > { %p592_p11 = por %p591_p10, %p590_p9 }
 0x2e5   : > { %p588_p8 = pneg %p587_p7 }
 0x2e7   : > { %p593_p12 = pnand %p592_p11, %p588_p8 }
 0x2e9   : > { %596 = shalt.err (!%p593_p12)
}
 0x2ea   : > { %526 = dma.vmem_to_hbm [thread:$0]  (%p704_p5), %s428_s12, 16, %s425_s15, %s415_s16  }
 0x2eb PF: > { %p532_p13 = scmp.ge.s32.totalorder %s631_s21, 2  ;;  %s439_s10 = sand.u32 1, %s619_s18  }
 0x2ec   : > { %s440_s11 = scalar_lea.sflag [#allocation3], %s439_s10 }
 0x2ed   : > { %p529_p0 = pnand %p532_p13, %p708_p6 }
 0x2ef   : > { %p530_p1 = pneg %p529_p0 }
 0x2f1   : > { %614 = dma.done.wait (%p530_p1), %s440_s11, 16  }
 0x2f2   : > { %616 = vsyncadd (%p530_p1), %s440_s11, 4294967280  ;;  %p15_p2 = scmp.ge.s32.totalorder %s691_s24, 4   ;;  %s785_s18 = smov %s623_s19 }
 0x2f3   : > { %s786_s19 = smov %s627_s20  ;;  %s787_s20 = smov %s702_s27 }
 0x2f4   : > { %s788_s21 = smov %s691_s24  ;;  %17 = sbr.rel (!%p15_p2) target bundleno = 3 (0x3), region = 78 }
 0x2f9   :  { %444 = vsyncpa [#allocation3], 1 }
 0x2fa   :  { %446 = vsyncpa [#allocation3 + $0x1], 1 }

</bundles_post_ra>
